<compile_context>
chip_gen: v7x
topology: tpu7x:2x2x1
jax: 0.10.0
libtpu: 0.0.40
codegen_flags: <defaults>
</compile_context>

<pallas_src>
import functools

import jax
import jax.numpy as jnp
from jax.experimental import pallas as pl
from jax.experimental.pallas import tpu as pltpu


def _ptuning_embed_kernel(P, S, W, ids_ref, prompt_ref, embed_hbm, out_ref,
                          copy_sems):
    """Writes inputs_embeds[b] = concat([prompt_table, embed_table[ids[b]]]).

    ids_ref:    SMEM (B, S) int32   -- scalar-prefetched token ids
    prompt_ref: VMEM (P, H)         -- learnable prompt table (resident across grid)
    embed_hbm:  HBM  (V, H)         -- frozen vocab table (memory_space=pl.ANY)
    out_ref:    VMEM (1, P+S, H)    -- output tile for this batch element
    copy_sems:  (W,) DMA semaphores -- one per in-flight gathered row
    """
    b = pl.program_id(0)

    # Prompt rows: identical for every batch element -> plain vector copy of
    # the small, VMEM-resident prompt table into the first P output rows.
    out_ref[0, 0:P, :] = prompt_ref[...]

    # Token rows: true row gather.  Each embedding row is DMA'd straight from
    # the HBM vocab table into its slot of the output tile; up to W row copies
    # are kept in flight at a time.  S and W are static Python ints, so the
    # loops below are fully unrolled straight-line DMA issue/wait code.
    for base in range(0, S, W):
        n = min(W, S - base)
        copies = []
        for j in range(n):
            s = base + j
            tok = ids_ref[b, s]                     # scalar read from SMEM
            cp = pltpu.make_async_copy(
                embed_hbm.at[pl.ds(tok, 1), :],     # (1, H) source row in HBM
                out_ref.at[0, pl.ds(P + s, 1), :],  # (1, H) slot in output tile
                copy_sems.at[j],
            )
            cp.start()
            copies.append(cp)
        for cp in copies:
            cp.wait()


def ptuning_forward(input_ids, attention_mask, labels, prompt_table, embed_table,
                    *, max_inflight_rows=8):
    """JAX/Pallas equivalent of PTuningModel.forward up to the base_model call.

    Returns (inputs_embeds [B, P+S, H], attention_mask [B, P+S], labels [B, P+S]).
    """
    B, S = input_ids.shape
    P, H = prompt_table.shape
    V, He = embed_table.shape
    assert He == H, "prompt_embedding_dim must match the base-model hidden size"
    T = P + S

    out_dtype = embed_table.dtype                    # native dtype, no f32 upcast
    prompt_table = prompt_table.astype(out_dtype)    # no-op when dtypes already match
    ids = input_ids.astype(jnp.int32)                # token ids must lie in [0, V)

    W = max(1, min(max_inflight_rows, S))
    kernel = functools.partial(_ptuning_embed_kernel, P, S, W)

    inputs_embeds = pl.pallas_call(
        kernel,
        out_shape=jax.ShapeDtypeStruct((B, T, H), out_dtype),
        grid_spec=pltpu.PrefetchScalarGridSpec(
            num_scalar_prefetch=1,                   # ids -> SMEM, drives the gather
            grid=(B,),
            in_specs=[
                # prompt table: small, full-resident in VMEM (block == full dims)
                pl.BlockSpec((P, H), lambda b, ids_ref: (0, 0)),
                # vocab table: stays in HBM, rows fetched by manual DMA
                pl.BlockSpec(memory_space=pl.ANY),
            ],
            out_specs=pl.BlockSpec((1, T, H), lambda b, ids_ref: (b, 0, 0)),
            scratch_shapes=[pltpu.SemaphoreType.DMA((W,))],
        ),
        compiler_params=pltpu.CompilerParams(
            dimension_semantics=("parallel",),       # batches independent (v7x megacore)
        ),
    )(ids, prompt_table, embed_table)

    # Mask / label concatenation: trivial constant plumbing, kept in plain XLA.
    new_attention_mask = None
    if attention_mask is not None:
        prompt_mask = jnp.ones((B, P), dtype=attention_mask.dtype)
        new_attention_mask = jnp.concatenate([prompt_mask, attention_mask], axis=1)

    new_labels = None
    if labels is not None:
        prompt_labels = jnp.full((B, P), -100, dtype=labels.dtype)
        new_labels = jnp.concatenate([prompt_labels, labels], axis=1)

    # TODO(synk): base_model(inputs_embeds=..., attention_mask=..., labels=...)
    # is an external frozen pretrained transformer and is not reproduced here.
    return inputs_embeds, new_attention_mask, new_labels


if __name__ == "__main__":
    # Small, deterministic configuration (module defaults scaled down).
    B = 2      # batch size
    S = 8      # input sequence length
    P = 8      # num_virtual_tokens
    H = 128    # prompt_embedding_dim / hidden_size (lane-aligned)
    V = 128    # base model vocab size

    key = jax.random.PRNGKey(0)
    k_prompt, k_embed, k_ids, k_labels = jax.random.split(key, 4)

    # nn.init.normal_(prompt_embeddings.weight, std=0.02)
    prompt_table = 0.02 * jax.random.normal(k_prompt, (P, H), dtype=jnp.float32)
    # frozen base-model input embedding table (deterministic synthetic weights)
    embed_table = jax.random.normal(k_embed, (V, H), dtype=jnp.float32)

    input_ids = jax.random.randint(k_ids, (B, S), 0, V, dtype=jnp.int32)
    attention_mask = jnp.ones((B, S), dtype=jnp.int32)
    labels = jax.random.randint(k_labels, (B, S), 0, V, dtype=jnp.int32)

    inputs_embeds, attn_out, labels_out = jax.jit(ptuning_forward)(
        input_ids, attention_mask, labels, prompt_table, embed_table
    )
    jax.block_until_ready(inputs_embeds)

    # Pure-JAX reference (gather is exact -> bitwise comparison).
    ref_embeds = jnp.concatenate(
        [jnp.broadcast_to(prompt_table[None], (B, P, H)), embed_table[input_ids]],
        axis=1,
    )
    ref_mask = jnp.concatenate(
        [jnp.ones((B, P), dtype=attention_mask.dtype), attention_mask], axis=1
    )
    ref_labels = jnp.concatenate(
        [jnp.full((B, P), -100, dtype=labels.dtype), labels], axis=1
    )

    assert inputs_embeds.shape == (B, P + S, H)
    assert inputs_embeds.dtype == embed_table.dtype
    assert jnp.array_equal(inputs_embeds, ref_embeds)
    assert jnp.array_equal(attn_out, ref_mask)
    assert jnp.array_equal(labels_out, ref_labels)

    print("KERNEL_OK")
</pallas_src>

<mosaic_0001>
module attributes {stable_mosaic.version = 11 : i64} {
  func.func @_ptuning_embed_kernel(%arg0: i32, %arg1: memref<2x8xi32, #tpu.memory_space<smem>>, %arg2: memref<8x128xf32, #tpu.memory_space<vmem>>, %arg3: memref<128x128xf32, #tpu.memory_space<any>>, %arg4: memref<1x16x128xf32, #tpu.memory_space<vmem>>, %arg5: memref<8x!tpu.dma_semaphore, #tpu.memory_space<semaphore_mem>>) attributes {dimension_semantics = [#tpu.dimension_semantics<parallel>], iteration_bounds = array<i64: 2>, scalar_prefetch = 1 : i64, scratch_operands = 1 : i64, tpu.core_type = #tpu.core_type<tc>, window_params = [{pipeline_mode = #tpu.pipeline_mode<synchronous>, transform_indices = @transform_0, window_bounds = array<i64: 8, 128>}, {}, {transform_indices = @transform_2, window_bounds = array<i64: 1, 16, 128>}]} {
    %c0 = arith.constant 0 : index
    %c0_0 = arith.constant 0 : index
    %0 = vector.load %arg2[%c0, %c0_0] : memref<8x128xf32, #tpu.memory_space<vmem>>, vector<8x128xf32>
    %c0_1 = arith.constant 0 : index
    %c0_2 = arith.constant 0 : index
    %c0_3 = arith.constant 0 : index
    %1 = vector.load %arg4[%c0_1, %c0_2, %c0_3] : memref<1x16x128xf32, #tpu.memory_space<vmem>>, vector<1x8x128xf32>
    %2 = vector.shape_cast %1 : vector<1x8x128xf32> to vector<8x128xf32>
    %3 = vector.shape_cast %0 : vector<8x128xf32> to vector<1x8x128xf32>
    tpu.vector_store %arg4[%c0_1, %c0_2, %c0_3], %3 {strides = array<i32>} : memref<1x16x128xf32, #tpu.memory_space<vmem>>, vector<1x8x128xf32>,
    %4 = arith.index_cast %arg0 : i32 to index
    %c0_4 = arith.constant 0 : index
    %5 = memref.load %arg1[%4, %c0_4] : memref<2x8xi32, #tpu.memory_space<smem>>
    %c0_i32 = arith.constant 0 : i32
    %c0_i32_5 = arith.constant 0 : i32
    %c0_i32_6 = arith.constant 0 : i32
    %6 = tpu.memref_slice %arg3[%5, %c0_i32_6] : memref<128x128xf32, #tpu.memory_space<any>> -> memref<1x128xf32, #tpu.memory_space<any>>
    %c8_i32 = arith.constant 8 : i32
    %c0_i32_7 = arith.constant 0 : i32
    %7 = tpu.memref_slice %arg4[%c0_i32, %c8_i32, %c0_i32_7] : memref<1x16x128xf32, #tpu.memory_space<vmem>> -> memref<1x1x128xf32, #tpu.memory_space<vmem>>
    %8 = tpu.memref_squeeze %7 : memref<1x1x128xf32, #tpu.memory_space<vmem>> -> memref<1x128xf32, #tpu.memory_space<vmem>>
    %9 = tpu.memref_slice %arg5[%c0_i32_5] : memref<8x!tpu.dma_semaphore, #tpu.memory_space<semaphore_mem>> -> memref<1x!tpu.dma_semaphore, #tpu.memory_space<semaphore_mem>>
    %10 = tpu.memref_squeeze %9 : memref<1x!tpu.dma_semaphore, #tpu.memory_space<semaphore_mem>> -> memref<!tpu.dma_semaphore, #tpu.memory_space<semaphore_mem>>
    tpu.enqueue_dma source(%6 : memref<1x128xf32, #tpu.memory_space<any>>) target(%8 : memref<1x128xf32, #tpu.memory_space<vmem>>) target_semaphore(%10 : memref<!tpu.dma_semaphore, #tpu.memory_space<semaphore_mem>>)
    %11 = arith.index_cast %arg0 : i32 to index
    %c1 = arith.constant 1 : index
    %12 = memref.load %arg1[%11, %c1] : memref<2x8xi32, #tpu.memory_space<smem>>
    %c0_i32_8 = arith.constant 0 : i32
    %c1_i32 = arith.constant 1 : i32
    %c0_i32_9 = arith.constant 0 : i32
    %13 = tpu.memref_slice %arg3[%12, %c0_i32_9] : memref<128x128xf32, #tpu.memory_space<any>> -> memref<1x128xf32, #tpu.memory_space<any>>
    %c9_i32 = arith.constant 9 : i32
    %c0_i32_10 = arith.constant 0 : i32
    %14 = tpu.memref_slice %arg4[%c0_i32_8, %c9_i32, %c0_i32_10] : memref<1x16x128xf32, #tpu.memory_space<vmem>> -> memref<1x1x128xf32, #tpu.memory_space<vmem>>
    %15 = tpu.memref_squeeze %14 : memref<1x1x128xf32, #tpu.memory_space<vmem>> -> memref<1x128xf32, #tpu.memory_space<vmem>>
    %16 = tpu.memref_slice %arg5[%c1_i32] : memref<8x!tpu.dma_semaphore, #tpu.memory_space<semaphore_mem>> -> memref<1x!tpu.dma_semaphore, #tpu.memory_space<semaphore_mem>>
    %17 = tpu.memref_squeeze %16 : memref<1x!tpu.dma_semaphore, #tpu.memory_space<semaphore_mem>> -> memref<!tpu.dma_semaphore, #tpu.memory_space<semaphore_mem>>
    tpu.enqueue_dma source(%13 : memref<1x128xf32, #tpu.memory_space<any>>) target(%15 : memref<1x128xf32, #tpu.memory_space<vmem>>) target_semaphore(%17 : memref<!tpu.dma_semaphore, #tpu.memory_space<semaphore_mem>>)
    %18 = arith.index_cast %arg0 : i32 to index
    %c2 = arith.constant 2 : index
    %19 = memref.load %arg1[%18, %c2] : memref<2x8xi32, #tpu.memory_space<smem>>
    %c0_i32_11 = arith.constant 0 : i32
    %c2_i32 = arith.constant 2 : i32
    %c0_i32_12 = arith.constant 0 : i32
    %20 = tpu.memref_slice %arg3[%19, %c0_i32_12] : memref<128x128xf32, #tpu.memory_space<any>> -> memref<1x128xf32, #tpu.memory_space<any>>
    %c10_i32 = arith.constant 10 : i32
    %c0_i32_13 = arith.constant 0 : i32
    %21 = tpu.memref_slice %arg4[%c0_i32_11, %c10_i32, %c0_i32_13] : memref<1x16x128xf32, #tpu.memory_space<vmem>> -> memref<1x1x128xf32, #tpu.memory_space<vmem>>
    %22 = tpu.memref_squeeze %21 : memref<1x1x128xf32, #tpu.memory_space<vmem>> -> memref<1x128xf32, #tpu.memory_space<vmem>>
    %23 = tpu.memref_slice %arg5[%c2_i32] : memref<8x!tpu.dma_semaphore, #tpu.memory_space<semaphore_mem>> -> memref<1x!tpu.dma_semaphore, #tpu.memory_space<semaphore_mem>>
    %24 = tpu.memref_squeeze %23 : memref<1x!tpu.dma_semaphore, #tpu.memory_space<semaphore_mem>> -> memref<!tpu.dma_semaphore, #tpu.memory_space<semaphore_mem>>
    tpu.enqueue_dma source(%20 : memref<1x128xf32, #tpu.memory_space<any>>) target(%22 : memref<1x128xf32, #tpu.memory_space<vmem>>) target_semaphore(%24 : memref<!tpu.dma_semaphore, #tpu.memory_space<semaphore_mem>>)
    %25 = arith.index_cast %arg0 : i32 to index
    %c3 = arith.constant 3 : index
    %26 = memref.load %arg1[%25, %c3] : memref<2x8xi32, #tpu.memory_space<smem>>
    %c0_i32_14 = arith.constant 0 : i32
    %c3_i32 = arith.constant 3 : i32
    %c0_i32_15 = arith.constant 0 : i32
    %27 = tpu.memref_slice %arg3[%26, %c0_i32_15] : memref<128x128xf32, #tpu.memory_space<any>> -> memref<1x128xf32, #tpu.memory_space<any>>
    %c11_i32 = arith.constant 11 : i32
    %c0_i32_16 = arith.constant 0 : i32
    %28 = tpu.memref_slice %arg4[%c0_i32_14, %c11_i32, %c0_i32_16] : memref<1x16x128xf32, #tpu.memory_space<vmem>> -> memref<1x1x128xf32, #tpu.memory_space<vmem>>
    %29 = tpu.memref_squeeze %28 : memref<1x1x128xf32, #tpu.memory_space<vmem>> -> memref<1x128xf32, #tpu.memory_space<vmem>>
    %30 = tpu.memref_slice %arg5[%c3_i32] : memref<8x!tpu.dma_semaphore, #tpu.memory_space<semaphore_mem>> -> memref<1x!tpu.dma_semaphore, #tpu.memory_space<semaphore_mem>>
    %31 = tpu.memref_squeeze %30 : memref<1x!tpu.dma_semaphore, #tpu.memory_space<semaphore_mem>> -> memref<!tpu.dma_semaphore, #tpu.memory_space<semaphore_mem>>
    tpu.enqueue_dma source(%27 : memref<1x128xf32, #tpu.memory_space<any>>) target(%29 : memref<1x128xf32, #tpu.memory_space<vmem>>) target_semaphore(%31 : memref<!tpu.dma_semaphore, #tpu.memory_space<semaphore_mem>>)
    %32 = arith.index_cast %arg0 : i32 to index
    %c4 = arith.constant 4 : index
    %33 = memref.load %arg1[%32, %c4] : memref<2x8xi32, #tpu.memory_space<smem>>
    %c0_i32_17 = arith.constant 0 : i32
    %c4_i32 = arith.constant 4 : i32
    %c0_i32_18 = arith.constant 0 : i32
    %34 = tpu.memref_slice %arg3[%33, %c0_i32_18] : memref<128x128xf32, #tpu.memory_space<any>> -> memref<1x128xf32, #tpu.memory_space<any>>
    %c12_i32 = arith.constant 12 : i32
    %c0_i32_19 = arith.constant 0 : i32
    %35 = tpu.memref_slice %arg4[%c0_i32_17, %c12_i32, %c0_i32_19] : memref<1x16x128xf32, #tpu.memory_space<vmem>> -> memref<1x1x128xf32, #tpu.memory_space<vmem>>
    %36 = tpu.memref_squeeze %35 : memref<1x1x128xf32, #tpu.memory_space<vmem>> -> memref<1x128xf32, #tpu.memory_space<vmem>>
    %37 = tpu.memref_slice %arg5[%c4_i32] : memref<8x!tpu.dma_semaphore, #tpu.memory_space<semaphore_mem>> -> memref<1x!tpu.dma_semaphore, #tpu.memory_space<semaphore_mem>>
    %38 = tpu.memref_squeeze %37 : memref<1x!tpu.dma_semaphore, #tpu.memory_space<semaphore_mem>> -> memref<!tpu.dma_semaphore, #tpu.memory_space<semaphore_mem>>
    tpu.enqueue_dma source(%34 : memref<1x128xf32, #tpu.memory_space<any>>) target(%36 : memref<1x128xf32, #tpu.memory_space<vmem>>) target_semaphore(%38 : memref<!tpu.dma_semaphore, #tpu.memory_space<semaphore_mem>>)
    %39 = arith.index_cast %arg0 : i32 to index
    %c5 = arith.constant 5 : index
    %40 = memref.load %arg1[%39, %c5] : memref<2x8xi32, #tpu.memory_space<smem>>
    %c0_i32_20 = arith.constant 0 : i32
    %c5_i32 = arith.constant 5 : i32
    %c0_i32_21 = arith.constant 0 : i32
    %41 = tpu.memref_slice %arg3[%40, %c0_i32_21] : memref<128x128xf32, #tpu.memory_space<any>> -> memref<1x128xf32, #tpu.memory_space<any>>
    %c13_i32 = arith.constant 13 : i32
    %c0_i32_22 = arith.constant 0 : i32
    %42 = tpu.memref_slice %arg4[%c0_i32_20, %c13_i32, %c0_i32_22] : memref<1x16x128xf32, #tpu.memory_space<vmem>> -> memref<1x1x128xf32, #tpu.memory_space<vmem>>
    %43 = tpu.memref_squeeze %42 : memref<1x1x128xf32, #tpu.memory_space<vmem>> -> memref<1x128xf32, #tpu.memory_space<vmem>>
    %44 = tpu.memref_slice %arg5[%c5_i32] : memref<8x!tpu.dma_semaphore, #tpu.memory_space<semaphore_mem>> -> memref<1x!tpu.dma_semaphore, #tpu.memory_space<semaphore_mem>>
    %45 = tpu.memref_squeeze %44 : memref<1x!tpu.dma_semaphore, #tpu.memory_space<semaphore_mem>> -> memref<!tpu.dma_semaphore, #tpu.memory_space<semaphore_mem>>
    tpu.enqueue_dma source(%41 : memref<1x128xf32, #tpu.memory_space<any>>) target(%43 : memref<1x128xf32, #tpu.memory_space<vmem>>) target_semaphore(%45 : memref<!tpu.dma_semaphore, #tpu.memory_space<semaphore_mem>>)
    %46 = arith.index_cast %arg0 : i32 to index
    %c6 = arith.constant 6 : index
    %47 = memref.load %arg1[%46, %c6] : memref<2x8xi32, #tpu.memory_space<smem>>
    %c0_i32_23 = arith.constant 0 : i32
    %c6_i32 = arith.constant 6 : i32
    %c0_i32_24 = arith.constant 0 : i32
    %48 = tpu.memref_slice %arg3[%47, %c0_i32_24] : memref<128x128xf32, #tpu.memory_space<any>> -> memref<1x128xf32, #tpu.memory_space<any>>
    %c14_i32 = arith.constant 14 : i32
    %c0_i32_25 = arith.constant 0 : i32
    %49 = tpu.memref_slice %arg4[%c0_i32_23, %c14_i32, %c0_i32_25] : memref<1x16x128xf32, #tpu.memory_space<vmem>> -> memref<1x1x128xf32, #tpu.memory_space<vmem>>
    %50 = tpu.memref_squeeze %49 : memref<1x1x128xf32, #tpu.memory_space<vmem>> -> memref<1x128xf32, #tpu.memory_space<vmem>>
    %51 = tpu.memref_slice %arg5[%c6_i32] : memref<8x!tpu.dma_semaphore, #tpu.memory_space<semaphore_mem>> -> memref<1x!tpu.dma_semaphore, #tpu.memory_space<semaphore_mem>>
    %52 = tpu.memref_squeeze %51 : memref<1x!tpu.dma_semaphore, #tpu.memory_space<semaphore_mem>> -> memref<!tpu.dma_semaphore, #tpu.memory_space<semaphore_mem>>
    tpu.enqueue_dma source(%48 : memref<1x128xf32, #tpu.memory_space<any>>) target(%50 : memref<1x128xf32, #tpu.memory_space<vmem>>) target_semaphore(%52 : memref<!tpu.dma_semaphore, #tpu.memory_space<semaphore_mem>>)
    %53 = arith.index_cast %arg0 : i32 to index
    %c7 = arith.constant 7 : index
    %54 = memref.load %arg1[%53, %c7] : memref<2x8xi32, #tpu.memory_space<smem>>
    %c0_i32_26 = arith.constant 0 : i32
    %c7_i32 = arith.constant 7 : i32
    %c0_i32_27 = arith.constant 0 : i32
    %55 = tpu.memref_slice %arg3[%54, %c0_i32_27] : memref<128x128xf32, #tpu.memory_space<any>> -> memref<1x128xf32, #tpu.memory_space<any>>
    %c15_i32 = arith.constant 15 : i32
    %c0_i32_28 = arith.constant 0 : i32
    %56 = tpu.memref_slice %arg4[%c0_i32_26, %c15_i32, %c0_i32_28] : memref<1x16x128xf32, #tpu.memory_space<vmem>> -> memref<1x1x128xf32, #tpu.memory_space<vmem>>
    %57 = tpu.memref_squeeze %56 : memref<1x1x128xf32, #tpu.memory_space<vmem>> -> memref<1x128xf32, #tpu.memory_space<vmem>>
    %58 = tpu.memref_slice %arg5[%c7_i32] : memref<8x!tpu.dma_semaphore, #tpu.memory_space<semaphore_mem>> -> memref<1x!tpu.dma_semaphore, #tpu.memory_space<semaphore_mem>>
    %59 = tpu.memref_squeeze %58 : memref<1x!tpu.dma_semaphore, #tpu.memory_space<semaphore_mem>> -> memref<!tpu.dma_semaphore, #tpu.memory_space<semaphore_mem>>
    tpu.enqueue_dma source(%55 : memref<1x128xf32, #tpu.memory_space<any>>) target(%57 : memref<1x128xf32, #tpu.memory_space<vmem>>) target_semaphore(%59 : memref<!tpu.dma_semaphore, #tpu.memory_space<semaphore_mem>>)
    %c0_i32_29 = arith.constant 0 : i32
    %c0_i32_30 = arith.constant 0 : i32
    %c0_i32_31 = arith.constant 0 : i32
    %60 = tpu.memref_slice %arg3[%5, %c0_i32_31] : memref<128x128xf32, #tpu.memory_space<any>> -> memref<1x128xf32, #tpu.memory_space<any>>
    %c8_i32_32 = arith.constant 8 : i32
    %c0_i32_33 = arith.constant 0 : i32
    %61 = tpu.memref_slice %arg4[%c0_i32_29, %c8_i32_32, %c0_i32_33] : memref<1x16x128xf32, #tpu.memory_space<vmem>> -> memref<1x1x128xf32, #tpu.memory_space<vmem>>
    %62 = tpu.memref_squeeze %61 : memref<1x1x128xf32, #tpu.memory_space<vmem>> -> memref<1x128xf32, #tpu.memory_space<vmem>>
    %63 = tpu.memref_slice %arg5[%c0_i32_30] : memref<8x!tpu.dma_semaphore, #tpu.memory_space<semaphore_mem>> -> memref<1x!tpu.dma_semaphore, #tpu.memory_space<semaphore_mem>>
    %64 = tpu.memref_squeeze %63 : memref<1x!tpu.dma_semaphore, #tpu.memory_space<semaphore_mem>> -> memref<!tpu.dma_semaphore, #tpu.memory_space<semaphore_mem>>
    tpu.wait_dma2 semaphore(%64 : memref<!tpu.dma_semaphore, #tpu.memory_space<semaphore_mem>>) src(%60 : memref<1x128xf32, #tpu.memory_space<any>>) dst(%62 : memref<1x128xf32, #tpu.memory_space<vmem>>)
    %c0_i32_34 = arith.constant 0 : i32
    %c1_i32_35 = arith.constant 1 : i32
    %c0_i32_36 = arith.constant 0 : i32
    %65 = tpu.memref_slice %arg3[%12, %c0_i32_36] : memref<128x128xf32, #tpu.memory_space<any>> -> memref<1x128xf32, #tpu.memory_space<any>>
    %c9_i32_37 = arith.constant 9 : i32
    %c0_i32_38 = arith.constant 0 : i32
    %66 = tpu.memref_slice %arg4[%c0_i32_34, %c9_i32_37, %c0_i32_38] : memref<1x16x128xf32, #tpu.memory_space<vmem>> -> memref<1x1x128xf32, #tpu.memory_space<vmem>>
    %67 = tpu.memref_squeeze %66 : memref<1x1x128xf32, #tpu.memory_space<vmem>> -> memref<1x128xf32, #tpu.memory_space<vmem>>
    %68 = tpu.memref_slice %arg5[%c1_i32_35] : memref<8x!tpu.dma_semaphore, #tpu.memory_space<semaphore_mem>> -> memref<1x!tpu.dma_semaphore, #tpu.memory_space<semaphore_mem>>
    %69 = tpu.memref_squeeze %68 : memref<1x!tpu.dma_semaphore, #tpu.memory_space<semaphore_mem>> -> memref<!tpu.dma_semaphore, #tpu.memory_space<semaphore_mem>>
    tpu.wait_dma2 semaphore(%69 : memref<!tpu.dma_semaphore, #tpu.memory_space<semaphore_mem>>) src(%65 : memref<1x128xf32, #tpu.memory_space<any>>) dst(%67 : memref<1x128xf32, #tpu.memory_space<vmem>>)
    %c0_i32_39 = arith.constant 0 : i32
    %c2_i32_40 = arith.constant 2 : i32
    %c0_i32_41 = arith.constant 0 : i32
    %70 = tpu.memref_slice %arg3[%19, %c0_i32_41] : memref<128x128xf32, #tpu.memory_space<any>> -> memref<1x128xf32, #tpu.memory_space<any>>
    %c10_i32_42 = arith.constant 10 : i32
    %c0_i32_43 = arith.constant 0 : i32
    %71 = tpu.memref_slice %arg4[%c0_i32_39, %c10_i32_42, %c0_i32_43] : memref<1x16x128xf32, #tpu.memory_space<vmem>> -> memref<1x1x128xf32, #tpu.memory_space<vmem>>
    %72 = tpu.memref_squeeze %71 : memref<1x1x128xf32, #tpu.memory_space<vmem>> -> memref<1x128xf32, #tpu.memory_space<vmem>>
    %73 = tpu.memref_slice %arg5[%c2_i32_40] : memref<8x!tpu.dma_semaphore, #tpu.memory_space<semaphore_mem>> -> memref<1x!tpu.dma_semaphore, #tpu.memory_space<semaphore_mem>>
    %74 = tpu.memref_squeeze %73 : memref<1x!tpu.dma_semaphore, #tpu.memory_space<semaphore_mem>> -> memref<!tpu.dma_semaphore, #tpu.memory_space<semaphore_mem>>
    tpu.wait_dma2 semaphore(%74 : memref<!tpu.dma_semaphore, #tpu.memory_space<semaphore_mem>>) src(%70 : memref<1x128xf32, #tpu.memory_space<any>>) dst(%72 : memref<1x128xf32, #tpu.memory_space<vmem>>)
    %c0_i32_44 = arith.constant 0 : i32
    %c3_i32_45 = arith.constant 3 : i32
    %c0_i32_46 = arith.constant 0 : i32
    %75 = tpu.memref_slice %arg3[%26, %c0_i32_46] : memref<128x128xf32, #tpu.memory_space<any>> -> memref<1x128xf32, #tpu.memory_space<any>>
    %c11_i32_47 = arith.constant 11 : i32
    %c0_i32_48 = arith.constant 0 : i32
    %76 = tpu.memref_slice %arg4[%c0_i32_44, %c11_i32_47, %c0_i32_48] : memref<1x16x128xf32, #tpu.memory_space<vmem>> -> memref<1x1x128xf32, #tpu.memory_space<vmem>>
    %77 = tpu.memref_squeeze %76 : memref<1x1x128xf32, #tpu.memory_space<vmem>> -> memref<1x128xf32, #tpu.memory_space<vmem>>
    %78 = tpu.memref_slice %arg5[%c3_i32_45] : memref<8x!tpu.dma_semaphore, #tpu.memory_space<semaphore_mem>> -> memref<1x!tpu.dma_semaphore, #tpu.memory_space<semaphore_mem>>
    %79 = tpu.memref_squeeze %78 : memref<1x!tpu.dma_semaphore, #tpu.memory_space<semaphore_mem>> -> memref<!tpu.dma_semaphore, #tpu.memory_space<semaphore_mem>>
    tpu.wait_dma2 semaphore(%79 : memref<!tpu.dma_semaphore, #tpu.memory_space<semaphore_mem>>) src(%75 : memref<1x128xf32, #tpu.memory_space<any>>) dst(%77 : memref<1x128xf32, #tpu.memory_space<vmem>>)
    %c0_i32_49 = arith.constant 0 : i32
    %c4_i32_50 = arith.constant 4 : i32
    %c0_i32_51 = arith.constant 0 : i32
    %80 = tpu.memref_slice %arg3[%33, %c0_i32_51] : memref<128x128xf32, #tpu.memory_space<any>> -> memref<1x128xf32, #tpu.memory_space<any>>
    %c12_i32_52 = arith.constant 12 : i32
    %c0_i32_53 = arith.constant 0 : i32
    %81 = tpu.memref_slice %arg4[%c0_i32_49, %c12_i32_52, %c0_i32_53] : memref<1x16x128xf32, #tpu.memory_space<vmem>> -> memref<1x1x128xf32, #tpu.memory_space<vmem>>
    %82 = tpu.memref_squeeze %81 : memref<1x1x128xf32, #tpu.memory_space<vmem>> -> memref<1x128xf32, #tpu.memory_space<vmem>>
    %83 = tpu.memref_slice %arg5[%c4_i32_50] : memref<8x!tpu.dma_semaphore, #tpu.memory_space<semaphore_mem>> -> memref<1x!tpu.dma_semaphore, #tpu.memory_space<semaphore_mem>>
    %84 = tpu.memref_squeeze %83 : memref<1x!tpu.dma_semaphore, #tpu.memory_space<semaphore_mem>> -> memref<!tpu.dma_semaphore, #tpu.memory_space<semaphore_mem>>
    tpu.wait_dma2 semaphore(%84 : memref<!tpu.dma_semaphore, #tpu.memory_space<semaphore_mem>>) src(%80 : memref<1x128xf32, #tpu.memory_space<any>>) dst(%82 : memref<1x128xf32, #tpu.memory_space<vmem>>)
    %c0_i32_54 = arith.constant 0 : i32
    %c5_i32_55 = arith.constant 5 : i32
    %c0_i32_56 = arith.constant 0 : i32
    %85 = tpu.memref_slice %arg3[%40, %c0_i32_56] : memref<128x128xf32, #tpu.memory_space<any>> -> memref<1x128xf32, #tpu.memory_space<any>>
    %c13_i32_57 = arith.constant 13 : i32
    %c0_i32_58 = arith.constant 0 : i32
    %86 = tpu.memref_slice %arg4[%c0_i32_54, %c13_i32_57, %c0_i32_58] : memref<1x16x128xf32, #tpu.memory_space<vmem>> -> memref<1x1x128xf32, #tpu.memory_space<vmem>>
    %87 = tpu.memref_squeeze %86 : memref<1x1x128xf32, #tpu.memory_space<vmem>> -> memref<1x128xf32, #tpu.memory_space<vmem>>
    %88 = tpu.memref_slice %arg5[%c5_i32_55] : memref<8x!tpu.dma_semaphore, #tpu.memory_space<semaphore_mem>> -> memref<1x!tpu.dma_semaphore, #tpu.memory_space<semaphore_mem>>
    %89 = tpu.memref_squeeze %88 : memref<1x!tpu.dma_semaphore, #tpu.memory_space<semaphore_mem>> -> memref<!tpu.dma_semaphore, #tpu.memory_space<semaphore_mem>>
    tpu.wait_dma2 semaphore(%89 : memref<!tpu.dma_semaphore, #tpu.memory_space<semaphore_mem>>) src(%85 : memref<1x128xf32, #tpu.memory_space<any>>) dst(%87 : memref<1x128xf32, #tpu.memory_space<vmem>>)
    %c0_i32_59 = arith.constant 0 : i32
    %c6_i32_60 = arith.constant 6 : i32
    %c0_i32_61 = arith.constant 0 : i32
    %90 = tpu.memref_slice %arg3[%47, %c0_i32_61] : memref<128x128xf32, #tpu.memory_space<any>> -> memref<1x128xf32, #tpu.memory_space<any>>
    %c14_i32_62 = arith.constant 14 : i32
    %c0_i32_63 = arith.constant 0 : i32
    %91 = tpu.memref_slice %arg4[%c0_i32_59, %c14_i32_62, %c0_i32_63] : memref<1x16x128xf32, #tpu.memory_space<vmem>> -> memref<1x1x128xf32, #tpu.memory_space<vmem>>
    %92 = tpu.memref_squeeze %91 : memref<1x1x128xf32, #tpu.memory_space<vmem>> -> memref<1x128xf32, #tpu.memory_space<vmem>>
    %93 = tpu.memref_slice %arg5[%c6_i32_60] : memref<8x!tpu.dma_semaphore, #tpu.memory_space<semaphore_mem>> -> memref<1x!tpu.dma_semaphore, #tpu.memory_space<semaphore_mem>>
    %94 = tpu.memref_squeeze %93 : memref<1x!tpu.dma_semaphore, #tpu.memory_space<semaphore_mem>> -> memref<!tpu.dma_semaphore, #tpu.memory_space<semaphore_mem>>
    tpu.wait_dma2 semaphore(%94 : memref<!tpu.dma_semaphore, #tpu.memory_space<semaphore_mem>>) src(%90 : memref<1x128xf32, #tpu.memory_space<any>>) dst(%92 : memref<1x128xf32, #tpu.memory_space<vmem>>)
    %c0_i32_64 = arith.constant 0 : i32
    %c7_i32_65 = arith.constant 7 : i32
    %c0_i32_66 = arith.constant 0 : i32
    %95 = tpu.memref_slice %arg3[%54, %c0_i32_66] : memref<128x128xf32, #tpu.memory_space<any>> -> memref<1x128xf32, #tpu.memory_space<any>>
    %c15_i32_67 = arith.constant 15 : i32
    %c0_i32_68 = arith.constant 0 : i32
    %96 = tpu.memref_slice %arg4[%c0_i32_64, %c15_i32_67, %c0_i32_68] : memref<1x16x128xf32, #tpu.memory_space<vmem>> -> memref<1x1x128xf32, #tpu.memory_space<vmem>>
    %97 = tpu.memref_squeeze %96 : memref<1x1x128xf32, #tpu.memory_space<vmem>> -> memref<1x128xf32, #tpu.memory_space<vmem>>
    %98 = tpu.memref_slice %arg5[%c7_i32_65] : memref<8x!tpu.dma_semaphore, #tpu.memory_space<semaphore_mem>> -> memref<1x!tpu.dma_semaphore, #tpu.memory_space<semaphore_mem>>
    %99 = tpu.memref_squeeze %98 : memref<1x!tpu.dma_semaphore, #tpu.memory_space<semaphore_mem>> -> memref<!tpu.dma_semaphore, #tpu.memory_space<semaphore_mem>>
    tpu.wait_dma2 semaphore(%99 : memref<!tpu.dma_semaphore, #tpu.memory_space<semaphore_mem>>) src(%95 : memref<1x128xf32, #tpu.memory_space<any>>) dst(%97 : memref<1x128xf32, #tpu.memory_space<vmem>>)
    return
  }
  func.func @transform_0(%arg0: i32, %arg1: memref<2x8xi32, #tpu.memory_space<smem>>) -> (i32, i32) {
    %c0_i32 = arith.constant 0 : i32
    %c0_i32_0 = arith.constant 0 : i32
    %c0_i32_1 = arith.constant 0 : i32
    return %c0_i32, %c0_i32_0 : i32, i32
  }
  func.func @transform_2(%arg0: i32, %arg1: memref<2x8xi32, #tpu.memory_space<smem>>) -> (i32, i32, i32) {
    %c0_i32 = arith.constant 0 : i32
    %c0_i32_0 = arith.constant 0 : i32
    %c0_i32_1 = arith.constant 0 : i32
    return %arg0, %c0_i32, %c0_i32_0 : i32, i32, i32
  }
}

</mosaic_0001>

<bundles_post_ra>
// kernel: ptuning_forward.1
= control target key start
LH: loop header
LB: loop body
LE: loop exit
PB: predicated region body
PF: predicated region fallthrough
CT: control target
= control target key end

     0   :  { %s1022_s0 = inlined_call_operand.vmem [shape: s32[2,8], index: 0, kind: input, shape index: {}]   ;;  %s1023_s1 = inlined_call_operand.vmem [shape: f32[8,128], index: 1, kind: input, shape index: {}]   ;;  %s1024_s2 = inlined_call_operand.hbm [shape: f32[128,128], index: 2, kind: input, shape index: {}]   ;;  %s1025_s3 = inlined_call_operand.hbm [shape: f32[2,16,128], index: 3, kind: output, shape index: {}]  }
   0x1   :  { %1027 = sst [smem:[#allocation36_spill]] %s1023_s1  ;;  %s8_s14 = sshll.u32 %s1022_s0, 4  ;;  %s9_s14 = int_to_ptr.vmem [resolvable:$true] %s8_s14 }
   0x2   :  { %s461_s15 = scalar_lea.vmem %s9_s14, 32  ;;  %p466_p1 = scmp.lt.s32.totalorder %s9_s14, %s9_s14 }
   0x3   :  { %p462_p0 = scmp.ne.s32.totalorder %s9_s14, %s461_s15  ;;  %p467_p2 = scmp.lt.s32.totalorder %s461_s15, %s461_s15 }
   0x5   :  { %p468_p3 = por %p467_p2, %p466_p1 }
   0x7   :  { %p469_p4 = pnand %p468_p3, %p462_p0 }
   0x9   :  { %472 = shalt.err (!%p469_p4)  }
   0xa   :  { %s747_s16 = smov [#allocation4]  }
   0xb   :  { %11 = dma.vmem_to_smem %s9_s14, 32, %s747_s16, [#allocation3] }
   0xc   :  { %709 = dma.done.wait [#allocation3], 32 }
   0xd   :  { %710 = vsyncadd [#allocation3], 4294967264 }
   0xe   :  { %13 = sfence }
   0xf   :  { %14 = vsyncpa [#allocation6], 0 }
  0x10   :  { %16 = vsyncpa [#allocation6 + $0x1], 0  ;;  %s774_s17 = smov 0   ;;  %s776_s18 = smov 0  }
  0x11   :  { %s778_s0 = smov 0   ;;  %s780_s19 = smov 0  }
  0x12 LB: > { %s795_s20 = sadd.s32 4294967295, %s745_s19   ;;  %s392_s21 = sadd.s32 4294967294, %s745_s19   ;;  %s745_s19 = sphi %s780_s19, %s1037_s19   ;;  %s741_s0 = sphi %s778_s0, %s1036_s0   ;;  %s737_s18 = sphi %s776_s18, %s1035_s18   ;;  %s733_s17 = sphi %s774_s17, %s1034_s17  }
  0x13   : > { %s799_s22 = sadd.s32 1, %s745_s19   ;;  %s50_s23 = sadd.s32 1, %s741_s0 }
  0x14   : > { %s47_s24 = ssub.s32 %s745_s19, %s799_s22  ;;  %p60_p5 = scmp.ne.s32.totalorder %s741_s0, %s737_s18 }
  0x15   : > { %p48_p6 = scmp.eq.s32.totalorder %s47_s24, 0  ;;  %p61_p7 = scmp.eq.s32.totalorder %s795_s20, 1 }
  0x16   : > { %p66_p8 = scmp.ne.s32.totalorder %s737_s18, %s733_s17  ;;  %p67_p9 = scmp.eq.s32.totalorder %s392_s21, 1 }
  0x17   : > { %s810_s25 = scalar_select %p48_p6, %s741_s0, %s50_s23  }
  0x18   : > { %p812_p10 = por %p61_p7, %p60_p5  ;;  %p816_p11 = por %p67_p9, %p66_p8 }
  0x19   : > { %1028 = sst [smem:[#allocation35_spill]] %s810_s25  ;;  %p394_p12 = scmp.ge.s32.totalorder %s745_s19, 1 }
  0x1a   : > { %p88_p13 = scmp.lt.s32.totalorder %s745_s19, 3 }
  0x1c   : > { %p89_p0 = pnand %p394_p12, %p88_p13 }
  0x1d   : > { %s1026_s28 = sand.u32 (!%p89_p0), 1, %s737_s18   ;;  %s1031_s1 = sld [smem:[#allocation36_spill]] (!%p89_p0) }
  0x1e   : > { %92 = sbr.rel (%p89_p0) target bundleno = 253 (0xfd), region = 24  ;;  %s827_s4 = sshll.u32 (!%p89_p0), %s795_s20, 7 }
  0x1f   : > { %s395_s5 = sshll.u32 (!%p89_p0), %s1026_s28, 4  ;;  %s106_s6 = sld [smem:[#allocation4 + %s827_s4]] (!%p89_p0) }
  0x20   : > { %s121_s7 = sadd.s32 (!%p89_p0), 1, %s827_s4  ;;  %s833_s8 = scalar_lea.vmem (!%p89_p0), [#allocation5], %s395_s5 }
  0x21   : > { %s109_s9 = scalar_lea.vmem (!%p89_p0), %s833_s8, 8 [#allocation5]  ;;  %s837_s10 = sld [smem:[#allocation4 + %s121_s7]] (!%p89_p0) }
  0x22   : > { %s117_s11 = sshll.u32 (!%p89_p0), %s109_s9, 4  ;;  %s125_s12 = scalar_lea.vmem (!%p89_p0), %s833_s8, 9 [#allocation5]  ;;  %s840_s11 = int_to_ptr.vmem [resolvable:$true] %s117_s11 }
  0x23   : > { %v103_v0 = vld [vmem:[%s1031_s1] sm:$0xff] (!%p89_p0)  ;;  %s134_s13 = sshll.u32 (!%p89_p0), %s125_s12, 4  ;;  %s138_s14 = sadd.s32 (!%p89_p0), 2, %s827_s4  ;;  %s842_s13 = int_to_ptr.vmem [resolvable:$true] %s134_s13 }
  0x24   : > { %104 = vst [vmem:[%s833_s8] sm:$0xff] (!%p89_p0), %v103_v0  ;;  %s845_s16 = sld [smem:[#allocation4 + %s138_s14]] (!%p89_p0)  ;;  %s142_s29 = scalar_lea.vmem (!%p89_p0), %s833_s8, 10 [#allocation5] }
  0x25   : > { %s397_s15 = sshll.u32 %s106_s6, 4  ;;  %s854_s9 = scalar_lea.hbm %s1024_s2, 2048 }
  0x26   : > { %s108_s24 = scalar_lea.hbm %s1024_s2, %s397_s15 }
  0x27   : > { %s473_s30 = scalar_lea.hbm %s108_s24, 16  ;;  %p476_p2 = scmp.lt.u32.totalorder %s108_s24, %s1024_s2 }
  0x28   : > { %p474_p1 = scmp.ne.s32.totalorder %s108_s24, %s473_s30  ;;  %p477_p3 = scmp.lt.u32.totalorder %s854_s9, %s473_s30 }
  0x29   : > { %p479_p5 = scmp.lt.u32.totalorder %s473_s30, %s108_s24 }
  0x2a   : > { %p478_p4 = por %p477_p3, %p476_p2 }
  0x2c   : > { %p480_p6 = por %p479_p5, %p478_p4 }
  0x2e   : > { %p481_p7 = pnand %p480_p6, %p474_p1 }
  0x30   : > { %484 = shalt.err (!%p481_p7)  }
  0x31   : > { %s485_s6 = scalar_lea.vmem %s840_s11, 16  ;;  %s748_s14 = smov [#allocation5]  }
  0x32   : > { %p486_p8 = scmp.ne.s32.totalorder %s840_s11, %s485_s6  ;;  %s487_s15 = sshll.u32 %s748_s14, 4  ;;  %s862_s15 = int_to_ptr.vmem [resolvable:$false] %s487_s15 }
  0x33   : > { %s865_s28 = scalar_lea.vmem %s862_s15, 512  ;;  %p490_p9 = scmp.lt.s32.totalorder %s840_s11, %s862_s15 }
  0x34   : > { %p491_p12 = scmp.lt.s32.totalorder %s865_s28, %s485_s6 }
  0x36   : > { %p492_p13 = por %p491_p12, %p490_p9 }
  0x38   : > { %p493_p0 = pnand %p492_p13, %p486_p8 }
  0x3a   : > { %496 = shalt.err (!%p493_p0)  }
  0x3b   : > { %120 = dma.hbm_to_vmem [thread:$0]  %s108_s24, 16, %s840_s11, [#allocation2] }
  0x3c   : > { %s398_s21 = sshll.u32 %s837_s10, 4  ;;  %s151_s23 = sshll.u32 %s142_s29, 4  ;;  %s875_s23 = int_to_ptr.vmem [resolvable:$true] %s151_s23 }
  0x3d   : > { %s124_s7 = scalar_lea.hbm %s1024_s2, %s398_s21 }
  0x3e   : > { %s497_s12 = scalar_lea.hbm %s124_s7, 16  ;;  %p500_p2 = scmp.lt.u32.totalorder %s124_s7, %s1024_s2 }
  0x3f   : > { %p498_p1 = scmp.ne.s32.totalorder %s124_s7, %s497_s12  ;;  %p501_p3 = scmp.lt.u32.totalorder %s854_s9, %s497_s12 }
  0x40   : > { %p503_p5 = scmp.lt.u32.totalorder %s497_s12, %s124_s7 }
  0x41   : > { %p502_p4 = por %p501_p3, %p500_p2 }
  0x43   : > { %p504_p6 = por %p503_p5, %p502_p4 }
  0x45   : > { %p505_p7 = pnand %p504_p6, %p498_p1 }
  0x47   : > { %508 = shalt.err (!%p505_p7)  }
  0x48   : > { %s509_s10 = scalar_lea.vmem %s842_s13, 16  ;;  %p514_p9 = scmp.lt.s32.totalorder %s842_s13, %s862_s15 }
  0x49   : > { %p510_p8 = scmp.ne.s32.totalorder %s842_s13, %s509_s10  ;;  %p515_p12 = scmp.lt.s32.totalorder %s865_s28, %s509_s10 }
  0x4b   : > { %p516_p13 = por %p515_p12, %p514_p9 }
  0x4d   : > { %p517_p0 = pnand %p516_p13, %p510_p8 }
  0x4f   : > { %520 = shalt.err (!%p517_p0)  }
  0x50   : > { %137 = dma.hbm_to_vmem [thread:$0]  %s124_s7, 16, %s842_s13, [#allocation2 + $0x1] }
  0x51   : > { %s399_s1 = sshll.u32 %s845_s16, 4  ;;  %s155_s11 = sadd.s32 3, %s827_s4 }
  0x52   : > { %s141_s6 = scalar_lea.hbm %s1024_s2, %s399_s1  ;;  %s892_s21 = sld [smem:[#allocation4 + %s155_s11]] }
  0x53   : > { %s521_s30 = scalar_lea.hbm %s141_s6, 16  ;;  %p524_p2 = scmp.lt.u32.totalorder %s141_s6, %s1024_s2 }
  0x54   : > { %p522_p1 = scmp.ne.s32.totalorder %s141_s6, %s521_s30  ;;  %p525_p3 = scmp.lt.u32.totalorder %s854_s9, %s521_s30 }
  0x55   : > { %p527_p5 = scmp.lt.u32.totalorder %s521_s30, %s141_s6 }
  0x56   : > { %p526_p4 = por %p525_p3, %p524_p2 }
  0x58   : > { %p528_p6 = por %p527_p5, %p526_p4 }
  0x5a   : > { %p529_p7 = pnand %p528_p6, %p522_p1 }
  0x5c   : > { %532 = shalt.err (!%p529_p7)  }
  0x5d   : > { %s533_s13 = scalar_lea.vmem %s875_s23, 16  ;;  %p538_p9 = scmp.lt.s32.totalorder %s875_s23, %s862_s15 }
  0x5e   : > { %p534_p8 = scmp.ne.s32.totalorder %s875_s23, %s533_s13  ;;  %p539_p12 = scmp.lt.s32.totalorder %s865_s28, %s533_s13 }
  0x60   : > { %p540_p13 = por %p539_p12, %p538_p9 }
  0x62   : > { %p541_p0 = pnand %p540_p13, %p534_p8 }
  0x64   : > { %544 = shalt.err (!%p541_p0)  }
  0x65   : > { %154 = dma.hbm_to_vmem [thread:$0]  %s141_s6, 16, %s875_s23, [#allocation2 + $0x2] }
  0x66   : > { %s159_s16 = scalar_lea.vmem %s833_s8, 11 [#allocation5]  ;;  %s172_s7 = sadd.s32 4, %s827_s4 }
  0x67   : > { %s168_s14 = sshll.u32 %s159_s16, 4  ;;  %s906_s10 = sld [smem:[#allocation4 + %s172_s7]]  ;;  %s169_s14 = int_to_ptr.vmem [resolvable:$true] %s168_s14 }
  0x68   : > { %s176_s1 = scalar_lea.vmem %s833_s8, 12 [#allocation5]  ;;  %s189_s24 = sadd.s32 5, %s827_s4 }
  0x69   : > { %s185_s11 = sshll.u32 %s176_s1, 4  ;;  %s400_s29 = sshll.u32 %s892_s21, 4  ;;  %s911_s11 = int_to_ptr.vmem [resolvable:$true] %s185_s11 }
  0x6a   : > { %s158_s12 = scalar_lea.hbm %s1024_s2, %s400_s29  ;;  %s916_s13 = sld [smem:[#allocation4 + %s189_s24]] }
  0x6b   : > { %s545_s23 = scalar_lea.hbm %s158_s12, 16  ;;  %p548_p2 = scmp.lt.u32.totalorder %s158_s12, %s1024_s2 }
  0x6c   : > { %p546_p1 = scmp.ne.s32.totalorder %s158_s12, %s545_s23  ;;  %p549_p3 = scmp.lt.u32.totalorder %s854_s9, %s545_s23 }
  0x6d   : > { %p551_p5 = scmp.lt.u32.totalorder %s545_s23, %s158_s12 }
  0x6e   : > { %p550_p4 = por %p549_p3, %p548_p2 }
  0x70   : > { %p552_p6 = por %p551_p5, %p550_p4 }
  0x72   : > { %p553_p7 = pnand %p552_p6, %p546_p1 }
  0x74   : > { %556 = shalt.err (!%p553_p7)  }
  0x75   : > { %s557_s21 = scalar_lea.vmem %s169_s14, 16  ;;  %p562_p9 = scmp.lt.s32.totalorder %s169_s14, %s862_s15 }
  0x76   : > { %p558_p8 = scmp.ne.s32.totalorder %s169_s14, %s557_s21  ;;  %p563_p12 = scmp.lt.s32.totalorder %s865_s28, %s557_s21 }
  0x78   : > { %p564_p13 = por %p563_p12, %p562_p9 }
  0x7a   : > { %p565_p0 = pnand %p564_p13, %p558_p8 }
  0x7c   : > { %568 = shalt.err (!%p565_p0)  }
  0x7d   : > { %171 = dma.hbm_to_vmem [thread:$0]  %s158_s12, 16, %s169_s14, [#allocation2 + $0x3] }
  0x7e   : > { %s401_s25 = sshll.u32 %s906_s10, 4  ;;  %s193_s16 = scalar_lea.vmem %s833_s8, 13 [#allocation5] }
  0x7f   : > { %s175_s24 = scalar_lea.hbm %s1024_s2, %s401_s25  ;;  %s202_s29 = sshll.u32 %s193_s16, 4  ;;  %s203_s29 = int_to_ptr.vmem [resolvable:$true] %s202_s29 }
  0x80   : > { %s569_s30 = scalar_lea.hbm %s175_s24, 16  ;;  %p572_p2 = scmp.lt.u32.totalorder %s175_s24, %s1024_s2 }
  0x81   : > { %p570_p1 = scmp.ne.s32.totalorder %s175_s24, %s569_s30  ;;  %p573_p3 = scmp.lt.u32.totalorder %s854_s9, %s569_s30 }
  0x82   : > { %p575_p5 = scmp.lt.u32.totalorder %s569_s30, %s175_s24 }
  0x83   : > { %p574_p4 = por %p573_p3, %p572_p2 }
  0x85   : > { %p576_p6 = por %p575_p5, %p574_p4 }
  0x87   : > { %p577_p7 = pnand %p576_p6, %p570_p1 }
  0x89   : > { %580 = shalt.err (!%p577_p7)  }
  0x8a   : > { %s581_s14 = scalar_lea.vmem %s911_s11, 16  ;;  %p586_p9 = scmp.lt.s32.totalorder %s911_s11, %s862_s15 }
  0x8b   : > { %p582_p8 = scmp.ne.s32.totalorder %s911_s11, %s581_s14  ;;  %p587_p12 = scmp.lt.s32.totalorder %s865_s28, %s581_s14 }
  0x8d   : > { %p588_p13 = por %p587_p12, %p586_p9 }
  0x8f   : > { %p589_p0 = pnand %p588_p13, %p582_p8 }
  0x91   : > { %592 = shalt.err (!%p589_p0)  }
  0x92   : > { %188 = dma.hbm_to_vmem [thread:$0]  %s175_s24, 16, %s911_s11, [#allocation2 + $0x4] }
  0x93   : > { %s206_s10 = sadd.s32 6, %s827_s4  ;;  %s402_s12 = sshll.u32 %s916_s13, 4 }
  0x94   : > { %s207_s6 = sld [smem:[#allocation4 + %s206_s10]]  ;;  %s192_s16 = scalar_lea.hbm %s1024_s2, %s402_s12 }
  0x95   : > { %s210_s7 = scalar_lea.vmem %s833_s8, 14 [#allocation5]  ;;  %s593_s1 = scalar_lea.hbm %s192_s16, 16 }
  0x96   : > { %p594_p1 = scmp.ne.s32.totalorder %s192_s16, %s593_s1  ;;  %p596_p2 = scmp.lt.u32.totalorder %s192_s16, %s1024_s2 }
  0x97   : > { %p597_p3 = scmp.lt.u32.totalorder %s854_s9, %s593_s1  ;;  %p599_p5 = scmp.lt.u32.totalorder %s593_s1, %s192_s16 }
  0x99   : > { %p598_p4 = por %p597_p3, %p596_p2 }
  0x9b   : > { %p600_p6 = por %p599_p5, %p598_p4 }
  0x9d   : > { %p601_p7 = pnand %p600_p6, %p594_p1 }
  0x9f   : > { %604 = shalt.err (!%p601_p7)  }
  0xa0   : > { %s605_s11 = scalar_lea.vmem %s203_s29, 16  ;;  %p610_p9 = scmp.lt.s32.totalorder %s203_s29, %s862_s15 }
  0xa1   : > { %p606_p8 = scmp.ne.s32.totalorder %s203_s29, %s605_s11  ;;  %p611_p12 = scmp.lt.s32.totalorder %s865_s28, %s605_s11 }
  0xa3   : > { %p612_p13 = por %p611_p12, %p610_p9 }
  0xa5   : > { %p613_p0 = pnand %p612_p13, %p606_p8 }
  0xa7   : > { %616 = shalt.err (!%p613_p0)  }
  0xa8   : > { %205 = dma.hbm_to_vmem [thread:$0]  %s192_s16, 16, %s203_s29, [#allocation2 + $0x5] }
  0xa9   : > { %s219_s13 = sshll.u32 %s210_s7, 4  ;;  %s223_s24 = sadd.s32 7, %s827_s4  ;;  %s220_s13 = int_to_ptr.vmem [resolvable:$true] %s219_s13 }
  0xaa   : > { %s224_s23 = sld [smem:[#allocation4 + %s223_s24]]  ;;  %s227_s14 = scalar_lea.vmem %s833_s8, 15 [#allocation5] }
  0xab   : > { %s403_s10 = sshll.u32 %s207_s6, 4  ;;  %s236_s12 = sshll.u32 %s227_s14, 4  ;;  %s237_s12 = int_to_ptr.vmem [resolvable:$true] %s236_s12 }
  0xac   : > { %s209_s1 = scalar_lea.hbm %s1024_s2, %s403_s10 }
  0xad   : > { %s617_s30 = scalar_lea.hbm %s209_s1, 16  ;;  %p620_p2 = scmp.lt.u32.totalorder %s209_s1, %s1024_s2 }
  0xae   : > { %p618_p1 = scmp.ne.s32.totalorder %s209_s1, %s617_s30  ;;  %p621_p3 = scmp.lt.u32.totalorder %s854_s9, %s617_s30 }
  0xaf   : > { %p623_p5 = scmp.lt.u32.totalorder %s617_s30, %s209_s1 }
  0xb0   : > { %p622_p4 = por %p621_p3, %p620_p2 }
  0xb2   : > { %p624_p6 = por %p623_p5, %p622_p4 }
  0xb4   : > { %p625_p7 = pnand %p624_p6, %p618_p1 }
  0xb6   : > { %628 = shalt.err (!%p625_p7)  }
  0xb7   : > { %s629_s4 = scalar_lea.vmem %s220_s13, 16  ;;  %p634_p9 = scmp.lt.s32.totalorder %s220_s13, %s862_s15 }
  0xb8   : > { %p630_p8 = scmp.ne.s32.totalorder %s220_s13, %s629_s4  ;;  %p635_p12 = scmp.lt.s32.totalorder %s865_s28, %s629_s4 }
  0xba   : > { %p636_p13 = por %p635_p12, %p634_p9 }
  0xbc   : > { %p637_p0 = pnand %p636_p13, %p630_p8 }
  0xbe   : > { %640 = shalt.err (!%p637_p0)  }
  0xbf   : > { %222 = dma.hbm_to_vmem [thread:$0]  %s209_s1, 16, %s220_s13, [#allocation2 + $0x6] }
  0xc0   : > { %s404_s29 = sshll.u32 %s224_s23, 4 }
  0xc1   : > { %s226_s7 = scalar_lea.hbm %s1024_s2, %s404_s29 }
  0xc2   : > { %s641_s24 = scalar_lea.hbm %s226_s7, 16  ;;  %p644_p2 = scmp.lt.u32.totalorder %s226_s7, %s1024_s2 }
  0xc3   : > { %p642_p1 = scmp.ne.s32.totalorder %s226_s7, %s641_s24  ;;  %p645_p3 = scmp.lt.u32.totalorder %s854_s9, %s641_s24 }
  0xc4   : > { %p647_p5 = scmp.lt.u32.totalorder %s641_s24, %s226_s7 }
  0xc5   : > { %p646_p4 = por %p645_p3, %p644_p2 }
  0xc7   : > { %p648_p6 = por %p647_p5, %p646_p4 }
  0xc9   : > { %p649_p7 = pnand %p648_p6, %p642_p1 }
  0xcb   : > { %652 = shalt.err (!%p649_p7)  }
  0xcc   : > { %s653_s13 = scalar_lea.vmem %s237_s12, 16  ;;  %p658_p9 = scmp.lt.s32.totalorder %s237_s12, %s862_s15 }
  0xcd   : > { %p654_p8 = scmp.ne.s32.totalorder %s237_s12, %s653_s13  ;;  %p659_p12 = scmp.lt.s32.totalorder %s865_s28, %s653_s13 }
  0xcf   : > { %p660_p13 = por %p659_p12, %p658_p9 }
  0xd1   : > { %p661_p0 = pnand %p660_p13, %p654_p8 }
  0xd3   : > { %664 = shalt.err (!%p661_p0)  }
  0xd4   : > { %239 = dma.hbm_to_vmem [thread:$0]  %s226_s7, 16, %s237_s12, [#allocation2 + $0x7] }
  0xd5   : > { %711 = dma.done.wait [#allocation2], 16 }
  0xd6   : > { %712 = vsyncadd [#allocation2], 4294967280 }
  0xd7   : > { %713 = dma.done.wait [#allocation2 + $0x1], 16 }
  0xd8   : > { %714 = vsyncadd [#allocation2 + $0x1], 4294967280 }
  0xd9   : > { %715 = dma.done.wait [#allocation2 + $0x2], 16 }
  0xda   : > { %716 = vsyncadd [#allocation2 + $0x2], 4294967280 }
  0xdb   : > { %717 = dma.done.wait [#allocation2 + $0x3], 16 }
  0xdc   : > { %718 = vsyncadd [#allocation2 + $0x3], 4294967280 }
  0xdd   : > { %719 = dma.done.wait [#allocation2 + $0x4], 16 }
  0xde   : > { %720 = vsyncadd [#allocation2 + $0x4], 4294967280 }
  0xdf   : > { %721 = dma.done.wait [#allocation2 + $0x5], 16 }
  0xe0   : > { %722 = vsyncadd [#allocation2 + $0x5], 4294967280 }
  0xe1   : > { %723 = dma.done.wait [#allocation2 + $0x6], 16 }
  0xe2   : > { %724 = vsyncadd [#allocation2 + $0x6], 4294967280 }
  0xe3   : > { %725 = dma.done.wait [#allocation2 + $0x7], 16 }
  0xe4   : > { %726 = vsyncadd [#allocation2 + $0x7], 4294967280  ;;  %s418_s9 = sshll.u32 %s795_s20, 8  ;;  %s271_s25 = sshll.u32 %s833_s8, 4  ;;  %s978_s25 = int_to_ptr.vmem [resolvable:$true] %s271_s25 }
  0xe5   : > { %s975_s21 = scalar_lea.hbm %s1025_s3, %s418_s9  ;;  %s1032_s1 = sand.u32 1, %s737_s18  }
  0xe6   : > { %s258_s30 = scalar_lea.sflag [#allocation6], %s1032_s1  ;;  %s665_s5 = scalar_lea.vmem %s978_s25, 256 }
  0xe7   : > { %p666_p1 = scmp.ne.s32.totalorder %s978_s25, %s665_s5  ;;  %p672_p4 = scmp.lt.s32.totalorder %s978_s25, %s862_s15 }
  0xe8   : > { %p673_p5 = scmp.lt.s32.totalorder %s865_s28, %s665_s5 }
  0xe9   : > { %p667_p2 = pnand %p666_p1, %p812_p10 }
  0xea   : > { %p674_p6 = por %p673_p5, %p672_p4 }
  0xeb   : > { %p668_p3 = pneg %p667_p2 }
  0xed   : > { %p675_p7 = pnand %p674_p6, %p668_p3 }
  0xef   : > { %678 = shalt.err (!%p675_p7)
}
  0xf0   : > { %s679_s20 = scalar_lea.hbm %s975_s21, 256  ;;  %s683_s4 = scalar_lea.hbm %s1025_s3, 512 }
  0xf1   : > { %p680_p8 = scmp.ne.s32.totalorder %s975_s21, %s679_s20  ;;  %p684_p13 = scmp.lt.u32.totalorder %s975_s21, %s1025_s3 }
  0xf2   : > { %p685_p0 = scmp.lt.u32.totalorder %s683_s4, %s679_s20  ;;  %p687_p2 = scmp.lt.u32.totalorder %s679_s20, %s975_s21 }
  0xf3   : > { %p681_p9 = pnand %p680_p8, %p812_p10 }
  0xf4   : > { %p686_p1 = por %p685_p0, %p684_p13 }
  0xf5   : > { %p682_p12 = pneg %p681_p9 }
  0xf6   : > { %p688_p3 = por %p687_p2, %p686_p1 }
  0xf8   : > { %p689_p4 = pnand %p688_p3, %p682_p12 }
  0xfa   : > { %692 = shalt.err (!%p689_p4)
}
  0xfb   : > { %s749_s28 = smov 128   ;;  %s750_s6 = smov 8  }
  0xfc   : > { %419 = dma.vmem_to_hbm [thread:$0]  (%p812_p10), %s978_s25, 256, %s975_s21, %s258_s30, %s749_s28, %s749_s28, %s750_s6  }
  0xfd PF: > { %p425_p5 = scmp.ge.s32.totalorder %s745_s19, 2  ;;  %s286_s16 = sand.u32 1, %s733_s17  }
  0xfe   : > { %s287_s7 = scalar_lea.sflag [#allocation6], %s286_s16 }
  0xff   : > { %p422_p6 = pnand %p425_p5, %p816_p11 }
 0x101   : > { %728 = dma.done.wait (!%p422_p6), %s287_s7, 256  }
 0x102   : > { %730 = vsyncadd (!%p422_p6), %s287_s7, 4294967040  ;;  %s1033_s24 = sld [smem:[#allocation35_spill]]  ;;  %p19_p7 = scmp.ge.s32.totalorder %s799_s22, 4  }
 0x103   : > { %s1034_s17 = smov %s737_s18  ;;  %s1035_s18 = smov %s741_s0 }
 0x104   : > { %s1037_s19 = smov %s799_s22  ;;  %21 = sbr.rel (!%p19_p7) target bundleno = 18 (0x12), region = 118 }
 0x108   : > { %s1036_s0 = smov %s1033_s24 }
 0x10b   :  { %292 = vsyncpa [#allocation6], 1 }
 0x10c   :  { %294 = vsyncpa [#allocation6 + $0x1], 1 }
 0x10d   :  { %295 = vsyncmov [#allocation2] }
 0x110   :  { %s296_s19 = vpop.sfrf %295 }
 0x111   :  { %p410_p10 = scmp.ne.s32.totalorder %s296_s19, 0 }
 0x113   :  { %300 = shalt.err (%p410_p10)  }
 0x114   :  { %302 = vsyncmov [#allocation2 + $0x1] }
 0x117   :  { %s303_s26 = vpop.sfrf %302 }
 0x118   :  { %p411_p11 = scmp.ne.s32.totalorder %s303_s26, 0 }
 0x11a   :  { %307 = shalt.err (%p411_p11)  }
 0x11b   :  { %309 = vsyncmov [#allocation2 + $0x2] }
 0x11e   :  { %s310_s27 = vpop.sfrf %309 }
 0x11f   :  { %p412_p8 = scmp.ne.s32.totalorder %s310_s27, 0 }
 0x121   :  { %314 = shalt.err (%p412_p8)  }
 0x122   :  { %316 = vsyncmov [#allocation2 + $0x3] }
 0x125   :  { %s317_s14 = vpop.sfrf %316 }
 0x126   :  { %p413_p9 = scmp.ne.s32.totalorder %s317_s14, 0 }
 0x128   :  { %321 = shalt.err (%p413_p9)  }
 0x129   :  { %323 = vsyncmov [#allocation2 + $0x4] }
 0x12c   :  { %s324_s22 = vpop.sfrf %323 }
 0x12d   :  { %p414_p12 = scmp.ne.s32.totalorder %s324_s22, 0 }
 0x12f   :  { %328 = shalt.err (%p414_p12)  }
 0x130   :  { %330 = vsyncmov [#allocation2 + $0x5] }
 0x133   :  { %s331_s2 = vpop.sfrf %330 }
 0x134   :  { %p415_p13 = scmp.ne.s32.totalorder %s331_s2, 0 }
 0x136   :  { %335 = shalt.err (%p415_p13)  }
 0x137   :  { %337 = vsyncmov [#allocation2 + $0x6] }
 0x13a   :  { %s338_s3 = vpop.sfrf %337 }
 0x13b   :  { %p416_p0 = scmp.ne.s32.totalorder %s338_s3, 0 }
 0x13d   :  { %342 = shalt.err (%p416_p0)  }
 0x13e   :  { %344 = vsyncmov [#allocation2 + $0x7] }
 0x141   :  { %s345_s17 = vpop.sfrf %344 }
 0x142   :  { %p417_p1 = scmp.ne.s32.totalorder %s345_s17, 0 }
 0x144   :  { %349 = shalt.err (%p417_p1)  }

</bundles_post_ra>
